<compile_context>
chip_gen: v5e
topology: v5e:2x2
jax: 0.10.0
libtpu: 0.0.40
codegen_flags: <defaults>
</compile_context>

<pallas_src>
import jax
import jax.numpy as jnp
import numpy as np
from jax.experimental import pallas as pl
from jax.experimental.pallas import tpu as pltpu

# ---- module hyperparameters (ModulatedLayer(channels, forward_layers, conditioning_layers)) ----
CHANNELS = 32
FORWARD_LAYERS = 2         # hidden (Linear + act) layers in `f`, then a final Linear
CONDITIONING_LAYERS = 2    # same for `weight` / `bias`
NEG_SLOPE = 0.2            # activation = leaky_relu(0.2)

BATCH = 2
SEQ = 8

MAX_TILE_S = 4096          # sweep-able; a 4096-wide f32 tile is ~512 KB, far under scoped VMEM


def _leaky_relu(h):
    return jnp.where(h > 0, h, NEG_SLOPE * h)


def _stack_apply(w_ref, b_ref, h):
    """Apply a LinearOutputStack in channels-on-sublanes form: h <- W_i @ h + b_i."""
    n = w_ref.shape[0]
    for i in range(n):
        h = jnp.dot(w_ref[i], h, preferred_element_type=jnp.float32) + b_ref[i]
        if i < n - 1:                      # final Linear has no activation
            h = _leaky_relu(h)
    return h


# --------------------------------------------------------------------------- kernel
def modulated_kernel(x_ref, cond_ref, fw_ref, fb_ref, ww_ref, wb_ref, bw_ref, bb_ref,
                     out_ref, sigw_ref, bfin_ref):
    """One (batch, seq-tile) grid step, channels-on-sublanes layout.

    x_ref   : (1, C, TILE_S)  activation tile (io_dtype)
    cond_ref: (1, C, 1)       conditioning column for this batch element (f32)
    fw_ref  : (Lf, C, C)      f-stack weights (pre-transposed: h <- W @ h + b)
    fb_ref  : (Lf, C, 1)      f-stack biases
    ww/wb   : (Lc, C, C/1)    weight-stack params
    bw/bb   : (Lc, C, C/1)    bias-stack params
    out_ref : (1, C, TILE_S)  output tile (io_dtype)
    sigw_ref: (C, 1) f32      scratch: sigmoid(weight_stack(cond)), hoisted per batch
    bfin_ref: (C, 1) f32      scratch: bias_stack(cond), hoisted per batch
    """
    # ---- conditioning hoist: only on the first sequence tile of each batch element
    @pl.when(pl.program_id(1) == 0)
    def _():
        cond = cond_ref[0].astype(jnp.float32)              # (C, 1)
        w = _stack_apply(ww_ref, wb_ref, cond)              # weight stack on one column
        b = _stack_apply(bw_ref, bb_ref, cond)              # bias stack on one column
        sigw_ref[...] = jax.nn.sigmoid(w)
        bfin_ref[...] = b

    # ---- f-stack on the (C, TILE_S) tile: K=C on sublanes, seq on lanes (MXU matmuls)
    h = x_ref[0].astype(jnp.float32)                        # (C, TILE_S), f32 compute
    h = _stack_apply(fw_ref, fb_ref, h)

    # ---- modulate: broadcast the (C, 1) columns over the lane axis, store lane-dense
    out_ref[0] = (h * sigw_ref[...] + bfin_ref[...]).astype(out_ref.dtype)


# --------------------------------------------------------------------------- packing
def pack_params(f_w, f_b, wt_w, wt_b, bi_w, bi_b):
    """Host-side, one-time repack into channels-on-sublanes orientation.

    Inputs follow the y = x @ W + b convention: *_w (L, C, C), *_b (L, 1, C).
    Outputs: (L, C, C) transposed weights and (L, C, 1) column biases so the kernel
    computes h <- W^T @ h + b^T on (C, N) tiles.
    """
    t = lambda w: jnp.transpose(w, (0, 2, 1)).astype(jnp.float32)
    tb = lambda b: jnp.transpose(b, (0, 2, 1)).astype(jnp.float32)
    return t(f_w), tb(f_b), t(wt_w), tb(wt_b), t(bi_w), tb(bi_b)


# --------------------------------------------------------------------------- wrapper
def modulated_layer(x, conditioning, packed, *, io_dtype=jnp.float32):
    """x: (B, S, C), conditioning: (B, 1, C) -> (B, S, C) (module semantics)."""
    B, S, C = x.shape
    assert C == CHANNELS and conditioning.shape == (B, 1, C)
    fw, fb, ww, wb, bw, bb = packed
    Lf, Lc = fw.shape[0], ww.shape[0]

    # Channels-on-sublanes layout (layout plumbing only; see header TODO).
    xt = jnp.transpose(x, (0, 2, 1)).astype(io_dtype)                     # (B, C, S)
    condt = jnp.transpose(conditioning, (0, 2, 1)).astype(jnp.float32)    # (B, C, 1)

    # Sequence tiling: one tile if it fits, otherwise 4096-wide tiles + tail padding.
    if S <= MAX_TILE_S:
        tile_s, s_pad = S, S
    else:
        tile_s = MAX_TILE_S
        s_pad = pl.cdiv(S, tile_s) * tile_s
        if s_pad != S:
            xt = jnp.pad(xt, ((0, 0), (0, 0), (0, s_pad - S)))
    grid = (B, s_pad // tile_s)

    io_bytes = np.dtype(io_dtype).itemsize
    n_param = (Lf + 2 * Lc) * (C * C + C)
    cost = pl.CostEstimate(
        flops=2 * C * C * (Lf * B * s_pad + 2 * Lc * B) + 3 * B * s_pad * C,
        transcendentals=B * C,
        bytes_accessed=2 * B * s_pad * C * io_bytes + B * C * 4 + n_param * 4,
    )

    const3 = lambda b, s: (0, 0, 0)
    out = pl.pallas_call(
        modulated_kernel,
        out_shape=jax.ShapeDtypeStruct((B, C, s_pad), io_dtype),
        grid=grid,
        in_specs=[
            pl.BlockSpec((1, C, tile_s), lambda b, s: (b, 0, s)),   # x tile (pipelined)
            pl.BlockSpec((1, C, 1), lambda b, s: (b, 0, 0)),        # conditioning column
            pl.BlockSpec((Lf, C, C), const3),                       # f weights (resident)
            pl.BlockSpec((Lf, C, 1), const3),                       # f biases
            pl.BlockSpec((Lc, C, C), const3),                       # weight-stack weights
            pl.BlockSpec((Lc, C, 1), const3),                       # weight-stack biases
            pl.BlockSpec((Lc, C, C), const3),                       # bias-stack weights
            pl.BlockSpec((Lc, C, 1), const3),                       # bias-stack biases
        ],
        out_specs=pl.BlockSpec((1, C, tile_s), lambda b, s: (b, 0, s)),
        scratch_shapes=[pltpu.VMEM((C, 1), jnp.float32),            # sigmoid(weight(cond))
                        pltpu.VMEM((C, 1), jnp.float32)],           # bias(cond)
        compiler_params=pltpu.CompilerParams(
            # batch "parallel" (megacore sharding on v7x); seq must stay "arbitrary"
            # because the conditioning hoist reuses scratch across sequence tiles.
            dimension_semantics=("parallel", "arbitrary")),
        cost_estimate=cost,
    )(xt, condt, fw, fb, ww, wb, bw, bb)

    return jnp.transpose(out[:, :, :S], (0, 2, 1))


# ---------------- deterministic parameter init (synthetic, PyTorch-Linear-like) ------------
def init_stack_params(key, n_hidden, channels):
    total = n_hidden + 1
    kw, kb = jax.random.split(key)
    bound = 1.0 / np.sqrt(channels)
    w = jax.random.uniform(kw, (total, channels, channels), jnp.float32, -bound, bound)
    b = jax.random.uniform(kb, (total, 1, channels), jnp.float32, -bound, bound)
    return w, b


# ---------------- pure-JAX reference for correctness check ------------
def ref_stack(h, w, b, n_hidden):
    for i in range(n_hidden + 1):
        h = h @ w[i] + b[i]
        if i < n_hidden:
            h = jnp.where(h > 0, h, NEG_SLOPE * h)
    return h


def ref_forward(x, conditioning, params):
    f_w, f_b, wt_w, wt_b, bi_w, bi_b = params
    B, S, C = x.shape
    x2 = x.reshape(B * S, C)
    cond2 = jnp.broadcast_to(conditioning, (B, S, C)).reshape(B * S, C)
    h = ref_stack(x2, f_w, f_b, FORWARD_LAYERS)
    w = ref_stack(cond2, wt_w, wt_b, CONDITIONING_LAYERS)
    b = ref_stack(cond2, bi_w, bi_b, CONDITIONING_LAYERS)
    return (h * jax.nn.sigmoid(w) + b).reshape(B, S, C)


if __name__ == "__main__":
    key = jax.random.PRNGKey(0)
    k_x, k_c, k_f, k_w, k_b = jax.random.split(key, 5)

    x = jax.random.normal(k_x, (BATCH, SEQ, CHANNELS), jnp.float32)
    conditioning = jax.random.normal(k_c, (BATCH, 1, CHANNELS), jnp.float32)

    params = (*init_stack_params(k_f, FORWARD_LAYERS, CHANNELS),
              *init_stack_params(k_w, CONDITIONING_LAYERS, CHANNELS),
              *init_stack_params(k_b, CONDITIONING_LAYERS, CHANNELS))
    packed = pack_params(*params)

    ref = jax.block_until_ready(ref_forward(x, conditioning, params))

    # f32 I/O: exact module semantics.
    out = jax.block_until_ready(modulated_layer(x, conditioning, packed))
    np.testing.assert_allclose(np.asarray(out), np.asarray(ref), rtol=1e-5, atol=1e-5)

    # bf16 activation I/O (v6e/v7x memory-roofline option): same kernel, looser tolerance.
    out_bf16 = jax.block_until_ready(
        modulated_layer(x, conditioning, packed, io_dtype=jnp.bfloat16))
    np.testing.assert_allclose(np.asarray(out_bf16.astype(jnp.float32)), np.asarray(ref),
                               rtol=5e-2, atol=5e-2)

    print("KERNEL_OK")
</pallas_src>

<mosaic_0001>
module attributes {stable_mosaic.version = 11 : i64} {
  func.func @modulated_kernel(%arg0: i32, %arg1: i32, %arg2: memref<1x32x8xf32, #tpu.memory_space<vmem>>, %arg3: memref<1x32x1xf32, #tpu.memory_space<vmem>>, %arg4: memref<3x32x32xf32, #tpu.memory_space<vmem>>, %arg5: memref<3x32x1xf32, #tpu.memory_space<vmem>>, %arg6: memref<3x32x32xf32, #tpu.memory_space<vmem>>, %arg7: memref<3x32x1xf32, #tpu.memory_space<vmem>>, %arg8: memref<3x32x32xf32, #tpu.memory_space<vmem>>, %arg9: memref<3x32x1xf32, #tpu.memory_space<vmem>>, %arg10: memref<1x32x8xf32, #tpu.memory_space<vmem>>, %arg11: memref<32x1xf32, #tpu.memory_space<vmem>>, %arg12: memref<32x1xf32, #tpu.memory_space<vmem>>) attributes {dimension_semantics = [#tpu.dimension_semantics<parallel>, #tpu.dimension_semantics<arbitrary>], iteration_bounds = array<i64: 2, 1>, scalar_prefetch = 0 : i64, scratch_operands = 2 : i64, tpu.core_type = #tpu.core_type<tc>, window_params = [{transform_indices = @transform_0, window_bounds = array<i64: 1, 32, 8>}, {transform_indices = @transform_1, window_bounds = array<i64: 1, 32, 1>}, {pipeline_mode = #tpu.pipeline_mode<synchronous>, transform_indices = @transform_2, window_bounds = array<i64: 3, 32, 32>}, {pipeline_mode = #tpu.pipeline_mode<synchronous>, transform_indices = @transform_3, window_bounds = array<i64: 3, 32, 1>}, {pipeline_mode = #tpu.pipeline_mode<synchronous>, transform_indices = @transform_4, window_bounds = array<i64: 3, 32, 32>}, {pipeline_mode = #tpu.pipeline_mode<synchronous>, transform_indices = @transform_5, window_bounds = array<i64: 3, 32, 1>}, {pipeline_mode = #tpu.pipeline_mode<synchronous>, transform_indices = @transform_6, window_bounds = array<i64: 3, 32, 32>}, {pipeline_mode = #tpu.pipeline_mode<synchronous>, transform_indices = @transform_7, window_bounds = array<i64: 3, 32, 1>}, {transform_indices = @transform_8, window_bounds = array<i64: 1, 32, 8>}]} {
    %c0_i32 = arith.constant 0 : i32
    %0 = arith.cmpi eq, %arg1, %c0_i32 : i32
    %1 = arith.extui %0 : i1 to i32
    %c0_i32_0 = arith.constant 0 : i32
    %2 = arith.cmpi ne, %1, %c0_i32_0 : i32
    scf.if %2 {
      %c0_32 = arith.constant 0 : index
      %c0_33 = arith.constant 0 : index
      %c0_34 = arith.constant 0 : index
      %45 = vector.load %arg3[%c0_32, %c0_33, %c0_34] : memref<1x32x1xf32, #tpu.memory_space<vmem>>, vector<1x32x1xf32>
      %46 = vector.shape_cast %45 : vector<1x32x1xf32> to vector<32x1xf32>
      %c0_35 = arith.constant 0 : index
      %c0_36 = arith.constant 0 : index
      %c0_37 = arith.constant 0 : index
      %47 = vector.load %arg6[%c0_35, %c0_36, %c0_37] : memref<3x32x32xf32, #tpu.memory_space<vmem>>, vector<1x32x32xf32>
      %48 = vector.shape_cast %47 : vector<1x32x32xf32> to vector<32x32xf32>
      %cst_38 = arith.constant dense<0.000000e+00> : vector<32x1xf32>
      %49 = tpu.matmul %48, %46, %cst_38 {dimension_numbers = #tpu.dot_dimension_numbers<[1], [0], [0], [1], [0, 0, 1, 1], [], []>} : vector<32x32xf32>, vector<32x1xf32>, vector<32x1xf32> -> vector<32x1xf32>
      %c0_39 = arith.constant 0 : index
      %c0_40 = arith.constant 0 : index
      %c0_41 = arith.constant 0 : index
      %50 = vector.load %arg7[%c0_39, %c0_40, %c0_41] : memref<3x32x1xf32, #tpu.memory_space<vmem>>, vector<1x32x1xf32>
      %51 = vector.shape_cast %50 : vector<1x32x1xf32> to vector<32x1xf32>
      %52 = arith.addf %49, %51 : vector<32x1xf32>
      %cst_42 = arith.constant 0.000000e+00 : f32
      %53 = vector.broadcast %cst_42 : f32 to vector<32x1xf32>
      %54 = arith.cmpf ogt, %52, %53 : vector<32x1xf32>
      %cst_43 = arith.constant 2.000000e-01 : f32
      %55 = vector.broadcast %cst_43 : f32 to vector<32x1xf32>
      %56 = arith.mulf %55, %52 : vector<32x1xf32>
      %57 = arith.select %54, %52, %56 : vector<32x1xi1>, vector<32x1xf32>
      %c1_44 = arith.constant 1 : index
      %c0_45 = arith.constant 0 : index
      %c0_46 = arith.constant 0 : index
      %58 = vector.load %arg6[%c1_44, %c0_45, %c0_46] : memref<3x32x32xf32, #tpu.memory_space<vmem>>, vector<1x32x32xf32>
      %59 = vector.shape_cast %58 : vector<1x32x32xf32> to vector<32x32xf32>
      %cst_47 = arith.constant dense<0.000000e+00> : vector<32x1xf32>
      %60 = tpu.matmul %59, %57, %cst_47 {dimension_numbers = #tpu.dot_dimension_numbers<[1], [0], [0], [1], [0, 0, 1, 1], [], []>} : vector<32x32xf32>, vector<32x1xf32>, vector<32x1xf32> -> vector<32x1xf32>
      %c1_48 = arith.constant 1 : index
      %c0_49 = arith.constant 0 : index
      %c0_50 = arith.constant 0 : index
      %61 = vector.load %arg7[%c1_48, %c0_49, %c0_50] : memref<3x32x1xf32, #tpu.memory_space<vmem>>, vector<1x32x1xf32>
      %62 = vector.shape_cast %61 : vector<1x32x1xf32> to vector<32x1xf32>
      %63 = arith.addf %60, %62 : vector<32x1xf32>
      %cst_51 = arith.constant 0.000000e+00 : f32
      %64 = vector.broadcast %cst_51 : f32 to vector<32x1xf32>
      %65 = arith.cmpf ogt, %63, %64 : vector<32x1xf32>
      %cst_52 = arith.constant 2.000000e-01 : f32
      %66 = vector.broadcast %cst_52 : f32 to vector<32x1xf32>
      %67 = arith.mulf %66, %63 : vector<32x1xf32>
      %68 = arith.select %65, %63, %67 : vector<32x1xi1>, vector<32x1xf32>
      %c2_53 = arith.constant 2 : index
      %c0_54 = arith.constant 0 : index
      %c0_55 = arith.constant 0 : index
      %69 = vector.load %arg6[%c2_53, %c0_54, %c0_55] : memref<3x32x32xf32, #tpu.memory_space<vmem>>, vector<1x32x32xf32>
      %70 = vector.shape_cast %69 : vector<1x32x32xf32> to vector<32x32xf32>
      %cst_56 = arith.constant dense<0.000000e+00> : vector<32x1xf32>
      %71 = tpu.matmul %70, %68, %cst_56 {dimension_numbers = #tpu.dot_dimension_numbers<[1], [0], [0], [1], [0, 0, 1, 1], [], []>} : vector<32x32xf32>, vector<32x1xf32>, vector<32x1xf32> -> vector<32x1xf32>
      %c2_57 = arith.constant 2 : index
      %c0_58 = arith.constant 0 : index
      %c0_59 = arith.constant 0 : index
      %72 = vector.load %arg7[%c2_57, %c0_58, %c0_59] : memref<3x32x1xf32, #tpu.memory_space<vmem>>, vector<1x32x1xf32>
      %73 = vector.shape_cast %72 : vector<1x32x1xf32> to vector<32x1xf32>
      %74 = arith.addf %71, %73 : vector<32x1xf32>
      %c0_60 = arith.constant 0 : index
      %c0_61 = arith.constant 0 : index
      %c0_62 = arith.constant 0 : index
      %75 = vector.load %arg8[%c0_60, %c0_61, %c0_62] : memref<3x32x32xf32, #tpu.memory_space<vmem>>, vector<1x32x32xf32>
      %76 = vector.shape_cast %75 : vector<1x32x32xf32> to vector<32x32xf32>
      %cst_63 = arith.constant dense<0.000000e+00> : vector<32x1xf32>
      %77 = tpu.matmul %76, %46, %cst_63 {dimension_numbers = #tpu.dot_dimension_numbers<[1], [0], [0], [1], [0, 0, 1, 1], [], []>} : vector<32x32xf32>, vector<32x1xf32>, vector<32x1xf32> -> vector<32x1xf32>
      %c0_64 = arith.constant 0 : index
      %c0_65 = arith.constant 0 : index
      %c0_66 = arith.constant 0 : index
      %78 = vector.load %arg9[%c0_64, %c0_65, %c0_66] : memref<3x32x1xf32, #tpu.memory_space<vmem>>, vector<1x32x1xf32>
      %79 = vector.shape_cast %78 : vector<1x32x1xf32> to vector<32x1xf32>
      %80 = arith.addf %77, %79 : vector<32x1xf32>
      %cst_67 = arith.constant 0.000000e+00 : f32
      %81 = vector.broadcast %cst_67 : f32 to vector<32x1xf32>
      %82 = arith.cmpf ogt, %80, %81 : vector<32x1xf32>
      %cst_68 = arith.constant 2.000000e-01 : f32
      %83 = vector.broadcast %cst_68 : f32 to vector<32x1xf32>
      %84 = arith.mulf %83, %80 : vector<32x1xf32>
      %85 = arith.select %82, %80, %84 : vector<32x1xi1>, vector<32x1xf32>
      %c1_69 = arith.constant 1 : index
      %c0_70 = arith.constant 0 : index
      %c0_71 = arith.constant 0 : index
      %86 = vector.load %arg8[%c1_69, %c0_70, %c0_71] : memref<3x32x32xf32, #tpu.memory_space<vmem>>, vector<1x32x32xf32>
      %87 = vector.shape_cast %86 : vector<1x32x32xf32> to vector<32x32xf32>
      %cst_72 = arith.constant dense<0.000000e+00> : vector<32x1xf32>
      %88 = tpu.matmul %87, %85, %cst_72 {dimension_numbers = #tpu.dot_dimension_numbers<[1], [0], [0], [1], [0, 0, 1, 1], [], []>} : vector<32x32xf32>, vector<32x1xf32>, vector<32x1xf32> -> vector<32x1xf32>
      %c1_73 = arith.constant 1 : index
      %c0_74 = arith.constant 0 : index
      %c0_75 = arith.constant 0 : index
      %89 = vector.load %arg9[%c1_73, %c0_74, %c0_75] : memref<3x32x1xf32, #tpu.memory_space<vmem>>, vector<1x32x1xf32>
      %90 = vector.shape_cast %89 : vector<1x32x1xf32> to vector<32x1xf32>
      %91 = arith.addf %88, %90 : vector<32x1xf32>
      %cst_76 = arith.constant 0.000000e+00 : f32
      %92 = vector.broadcast %cst_76 : f32 to vector<32x1xf32>
      %93 = arith.cmpf ogt, %91, %92 : vector<32x1xf32>
      %cst_77 = arith.constant 2.000000e-01 : f32
      %94 = vector.broadcast %cst_77 : f32 to vector<32x1xf32>
      %95 = arith.mulf %94, %91 : vector<32x1xf32>
      %96 = arith.select %93, %91, %95 : vector<32x1xi1>, vector<32x1xf32>
      %c2_78 = arith.constant 2 : index
      %c0_79 = arith.constant 0 : index
      %c0_80 = arith.constant 0 : index
      %97 = vector.load %arg8[%c2_78, %c0_79, %c0_80] : memref<3x32x32xf32, #tpu.memory_space<vmem>>, vector<1x32x32xf32>
      %98 = vector.shape_cast %97 : vector<1x32x32xf32> to vector<32x32xf32>
      %cst_81 = arith.constant dense<0.000000e+00> : vector<32x1xf32>
      %99 = tpu.matmul %98, %96, %cst_81 {dimension_numbers = #tpu.dot_dimension_numbers<[1], [0], [0], [1], [0, 0, 1, 1], [], []>} : vector<32x32xf32>, vector<32x1xf32>, vector<32x1xf32> -> vector<32x1xf32>
      %c2_82 = arith.constant 2 : index
      %c0_83 = arith.constant 0 : index
      %c0_84 = arith.constant 0 : index
      %100 = vector.load %arg9[%c2_82, %c0_83, %c0_84] : memref<3x32x1xf32, #tpu.memory_space<vmem>>, vector<1x32x1xf32>
      %101 = vector.shape_cast %100 : vector<1x32x1xf32> to vector<32x1xf32>
      %102 = arith.addf %99, %101 : vector<32x1xf32>
      %103 = arith.negf %74 : vector<32x1xf32>
      %104 = math.exp %103 : vector<32x1xf32>
      %cst_85 = arith.constant 1.000000e+00 : f32
      %105 = vector.broadcast %cst_85 : f32 to vector<32x1xf32>
      %106 = arith.addf %105, %104 : vector<32x1xf32>
      %107 = arith.divf %105, %106 : vector<32x1xf32>
      %c0_86 = arith.constant 0 : index
      %c0_87 = arith.constant 0 : index
      %108 = vector.load %arg11[%c0_86, %c0_87] : memref<32x1xf32, #tpu.memory_space<vmem>>, vector<32x1xf32>
      tpu.vector_store %arg11[%c0_86, %c0_87], %107 {strides = array<i32>} : memref<32x1xf32, #tpu.memory_space<vmem>>, vector<32x1xf32>,
      %c0_88 = arith.constant 0 : index
      %c0_89 = arith.constant 0 : index
      %109 = vector.load %arg12[%c0_88, %c0_89] : memref<32x1xf32, #tpu.memory_space<vmem>>, vector<32x1xf32>
      tpu.vector_store %arg12[%c0_88, %c0_89], %102 {strides = array<i32>} : memref<32x1xf32, #tpu.memory_space<vmem>>, vector<32x1xf32>,
    } else {
    }
    %c0 = arith.constant 0 : index
    %c0_1 = arith.constant 0 : index
    %c0_2 = arith.constant 0 : index
    %3 = vector.load %arg2[%c0, %c0_1, %c0_2] : memref<1x32x8xf32, #tpu.memory_space<vmem>>, vector<1x32x8xf32>
    %4 = vector.shape_cast %3 : vector<1x32x8xf32> to vector<32x8xf32>
    %c0_3 = arith.constant 0 : index
    %c0_4 = arith.constant 0 : index
    %c0_5 = arith.constant 0 : index
    %5 = vector.load %arg4[%c0_3, %c0_4, %c0_5] : memref<3x32x32xf32, #tpu.memory_space<vmem>>, vector<1x32x32xf32>
    %6 = vector.shape_cast %5 : vector<1x32x32xf32> to vector<32x32xf32>
    %cst = arith.constant dense<0.000000e+00> : vector<32x8xf32>
    %7 = tpu.matmul %6, %4, %cst {dimension_numbers = #tpu.dot_dimension_numbers<[1], [0], [0], [1], [0, 0, 1, 1], [], []>} : vector<32x32xf32>, vector<32x8xf32>, vector<32x8xf32> -> vector<32x8xf32>
    %c0_6 = arith.constant 0 : index
    %c0_7 = arith.constant 0 : index
    %c0_8 = arith.constant 0 : index
    %8 = vector.load %arg5[%c0_6, %c0_7, %c0_8] : memref<3x32x1xf32, #tpu.memory_space<vmem>>, vector<1x32x1xf32>
    %9 = vector.shape_cast %8 : vector<1x32x1xf32> to vector<32x1xf32>
    %10 = vector.broadcast %9 : vector<32x1xf32> to vector<32x8xf32>
    %11 = arith.addf %7, %10 : vector<32x8xf32>
    %cst_9 = arith.constant 0.000000e+00 : f32
    %12 = vector.broadcast %cst_9 : f32 to vector<32x8xf32>
    %13 = arith.cmpf ogt, %11, %12 : vector<32x8xf32>
    %cst_10 = arith.constant 2.000000e-01 : f32
    %14 = vector.broadcast %cst_10 : f32 to vector<32x8xf32>
    %15 = arith.mulf %14, %11 : vector<32x8xf32>
    %16 = arith.select %13, %11, %15 : vector<32x8xi1>, vector<32x8xf32>
    %c1 = arith.constant 1 : index
    %c0_11 = arith.constant 0 : index
    %c0_12 = arith.constant 0 : index
    %17 = vector.load %arg4[%c1, %c0_11, %c0_12] : memref<3x32x32xf32, #tpu.memory_space<vmem>>, vector<1x32x32xf32>
    %18 = vector.shape_cast %17 : vector<1x32x32xf32> to vector<32x32xf32>
    %cst_13 = arith.constant dense<0.000000e+00> : vector<32x8xf32>
    %19 = tpu.matmul %18, %16, %cst_13 {dimension_numbers = #tpu.dot_dimension_numbers<[1], [0], [0], [1], [0, 0, 1, 1], [], []>} : vector<32x32xf32>, vector<32x8xf32>, vector<32x8xf32> -> vector<32x8xf32>
    %c1_14 = arith.constant 1 : index
    %c0_15 = arith.constant 0 : index
    %c0_16 = arith.constant 0 : index
    %20 = vector.load %arg5[%c1_14, %c0_15, %c0_16] : memref<3x32x1xf32, #tpu.memory_space<vmem>>, vector<1x32x1xf32>
    %21 = vector.shape_cast %20 : vector<1x32x1xf32> to vector<32x1xf32>
    %22 = vector.broadcast %21 : vector<32x1xf32> to vector<32x8xf32>
    %23 = arith.addf %19, %22 : vector<32x8xf32>
    %cst_17 = arith.constant 0.000000e+00 : f32
    %24 = vector.broadcast %cst_17 : f32 to vector<32x8xf32>
    %25 = arith.cmpf ogt, %23, %24 : vector<32x8xf32>
    %cst_18 = arith.constant 2.000000e-01 : f32
    %26 = vector.broadcast %cst_18 : f32 to vector<32x8xf32>
    %27 = arith.mulf %26, %23 : vector<32x8xf32>
    %28 = arith.select %25, %23, %27 : vector<32x8xi1>, vector<32x8xf32>
    %c2 = arith.constant 2 : index
    %c0_19 = arith.constant 0 : index
    %c0_20 = arith.constant 0 : index
    %29 = vector.load %arg4[%c2, %c0_19, %c0_20] : memref<3x32x32xf32, #tpu.memory_space<vmem>>, vector<1x32x32xf32>
    %30 = vector.shape_cast %29 : vector<1x32x32xf32> to vector<32x32xf32>
    %cst_21 = arith.constant dense<0.000000e+00> : vector<32x8xf32>
    %31 = tpu.matmul %30, %28, %cst_21 {dimension_numbers = #tpu.dot_dimension_numbers<[1], [0], [0], [1], [0, 0, 1, 1], [], []>} : vector<32x32xf32>, vector<32x8xf32>, vector<32x8xf32> -> vector<32x8xf32>
    %c2_22 = arith.constant 2 : index
    %c0_23 = arith.constant 0 : index
    %c0_24 = arith.constant 0 : index
    %32 = vector.load %arg5[%c2_22, %c0_23, %c0_24] : memref<3x32x1xf32, #tpu.memory_space<vmem>>, vector<1x32x1xf32>
    %33 = vector.shape_cast %32 : vector<1x32x1xf32> to vector<32x1xf32>
    %34 = vector.broadcast %33 : vector<32x1xf32> to vector<32x8xf32>
    %35 = arith.addf %31, %34 : vector<32x8xf32>
    %c0_25 = arith.constant 0 : index
    %c0_26 = arith.constant 0 : index
    %36 = vector.load %arg11[%c0_25, %c0_26] : memref<32x1xf32, #tpu.memory_space<vmem>>, vector<32x1xf32>
    %37 = vector.broadcast %36 : vector<32x1xf32> to vector<32x8xf32>
    %38 = arith.mulf %35, %37 : vector<32x8xf32>
    %c0_27 = arith.constant 0 : index
    %c0_28 = arith.constant 0 : index
    %39 = vector.load %arg12[%c0_27, %c0_28] : memref<32x1xf32, #tpu.memory_space<vmem>>, vector<32x1xf32>
    %40 = vector.broadcast %39 : vector<32x1xf32> to vector<32x8xf32>
    %41 = arith.addf %38, %40 : vector<32x8xf32>
    %c0_29 = arith.constant 0 : index
    %c0_30 = arith.constant 0 : index
    %c0_31 = arith.constant 0 : index
    %42 = vector.load %arg10[%c0_29, %c0_30, %c0_31] : memref<1x32x8xf32, #tpu.memory_space<vmem>>, vector<1x32x8xf32>
    %43 = vector.shape_cast %42 : vector<1x32x8xf32> to vector<32x8xf32>
    %44 = vector.shape_cast %41 : vector<32x8xf32> to vector<1x32x8xf32>
    tpu.vector_store %arg10[%c0_29, %c0_30, %c0_31], %44 {strides = array<i32>} : memref<1x32x8xf32, #tpu.memory_space<vmem>>, vector<1x32x8xf32>,
    return
  }
  func.func @transform_0(%arg0: i32, %arg1: i32) -> (i32, i32, i32) {
    %c0_i32 = arith.constant 0 : i32
    %c0_i32_0 = arith.constant 0 : i32
    return %arg0, %c0_i32, %arg1 : i32, i32, i32
  }
  func.func @transform_1(%arg0: i32, %arg1: i32) -> (i32, i32, i32) {
    %c0_i32 = arith.constant 0 : i32
    %c0_i32_0 = arith.constant 0 : i32
    %c0_i32_1 = arith.constant 0 : i32
    return %arg0, %c0_i32, %c0_i32_0 : i32, i32, i32
  }
  func.func @transform_2(%arg0: i32, %arg1: i32) -> (i32, i32, i32) {
    %c0_i32 = arith.constant 0 : i32
    %c0_i32_0 = arith.constant 0 : i32
    %c0_i32_1 = arith.constant 0 : i32
    %c0_i32_2 = arith.constant 0 : i32
    return %c0_i32, %c0_i32_0, %c0_i32_1 : i32, i32, i32
  }
  func.func @transform_3(%arg0: i32, %arg1: i32) -> (i32, i32, i32) {
    %c0_i32 = arith.constant 0 : i32
    %c0_i32_0 = arith.constant 0 : i32
    %c0_i32_1 = arith.constant 0 : i32
    %c0_i32_2 = arith.constant 0 : i32
    return %c0_i32, %c0_i32_0, %c0_i32_1 : i32, i32, i32
  }
  func.func @transform_4(%arg0: i32, %arg1: i32) -> (i32, i32, i32) {
    %c0_i32 = arith.constant 0 : i32
    %c0_i32_0 = arith.constant 0 : i32
    %c0_i32_1 = arith.constant 0 : i32
    %c0_i32_2 = arith.constant 0 : i32
    return %c0_i32, %c0_i32_0, %c0_i32_1 : i32, i32, i32
  }
  func.func @transform_5(%arg0: i32, %arg1: i32) -> (i32, i32, i32) {
    %c0_i32 = arith.constant 0 : i32
    %c0_i32_0 = arith.constant 0 : i32
    %c0_i32_1 = arith.constant 0 : i32
    %c0_i32_2 = arith.constant 0 : i32
    return %c0_i32, %c0_i32_0, %c0_i32_1 : i32, i32, i32
  }
  func.func @transform_6(%arg0: i32, %arg1: i32) -> (i32, i32, i32) {
    %c0_i32 = arith.constant 0 : i32
    %c0_i32_0 = arith.constant 0 : i32
    %c0_i32_1 = arith.constant 0 : i32
    %c0_i32_2 = arith.constant 0 : i32
    return %c0_i32, %c0_i32_0, %c0_i32_1 : i32, i32, i32
  }
  func.func @transform_7(%arg0: i32, %arg1: i32) -> (i32, i32, i32) {
    %c0_i32 = arith.constant 0 : i32
    %c0_i32_0 = arith.constant 0 : i32
    %c0_i32_1 = arith.constant 0 : i32
    %c0_i32_2 = arith.constant 0 : i32
    return %c0_i32, %c0_i32_0, %c0_i32_1 : i32, i32, i32
  }
  func.func @transform_8(%arg0: i32, %arg1: i32) -> (i32, i32, i32) {
    %c0_i32 = arith.constant 0 : i32
    %c0_i32_0 = arith.constant 0 : i32
    return %arg0, %c0_i32, %arg1 : i32, i32, i32
  }
}

</mosaic_0001>

<bundles_post_ra>
// kernel: tpu_custom_call.1
= control target key start
LH: loop header
LB: loop body
LE: loop exit
PB: predicated region body
PF: predicated region fallthrough
CT: control target
= control target key end

     0   :  { %s1427_s27 = smov 0   ;;  %s1429_s28 = smov 0   ;;  %s1735_s0 = inlined_call_operand.vmem [shape: f32[2,32,8], index: 0, kind: input, shape index: {}]   ;;  %s1736_s1 = inlined_call_operand.vmem [shape: f32[2,32,1], index: 1, kind: input, shape index: {}]   ;;  %s1737_s2 = inlined_call_operand.vmem [shape: f32[3,32,32], index: 2, kind: input, shape index: {}]   ;;  %s1738_s3 = inlined_call_operand.vmem [shape: f32[3,32,1], index: 3, kind: input, shape index: {}]   ;;  %s1739_s4 = inlined_call_operand.vmem [shape: f32[3,32,32], index: 4, kind: input, shape index: {}]   ;;  %s1740_s5 = inlined_call_operand.vmem [shape: f32[3,32,1], index: 5, kind: input, shape index: {}]   ;;  %s1741_s6 = inlined_call_operand.vmem [shape: f32[3,32,32], index: 6, kind: input, shape index: {}]   ;;  %s1742_s7 = inlined_call_operand.vmem [shape: f32[3,32,1], index: 7, kind: input, shape index: {}]   ;;  %s1743_s8 = inlined_call_operand.vmem [shape: f32[2,32,8], index: 8, kind: output, shape index: {}]  }
   0x1   :  { %s1431_s29 = smov 0  }
   0x2 LB: > { %s30_s30 = sadd.s32 1, %s1375_s28  ;;  %p1201_p0 = scmp.ge.s32.totalorder %s1379_s29, 1  ;;  %s1379_s29 = sphi %s1431_s29, %s18_s29   ;;  %s1375_s28 = sphi %s1429_s28, %s1745_s28   ;;  %s1371_s27 = sphi %s1427_s27, %s1744_s27  }
   0x3   : > { %p32_p1 = scmp.ge.s32.totalorder %s30_s30, 2  ;;  %p291_p2 = scmp.lt.s32.totalorder %s1379_s29, 3 }
   0x5   : > { %s1747_s30 = smov (%p32_p1, %s30_s30), 0  ;;  %p292_p3 = pnand %p1201_p0, %p291_p2 }
   0x6   : > { %p336_p4 = scmp.lt.s32.totalorder (!%p292_p3), %s1371_s27, 1 }
   0x7   : > { %295 = sbr.rel (%p292_p3) target bundleno = 854 (0x356), region = 52 }
   0xc   : > { %s1749_s27 = smov (!%p336_p4, %s1371_s27), 1  ;;  %v367_v4 = vld [vmem:[%s1739_s4 + $0x10] sm:$0xff]  ;;  %vm373_vm0 = vcmask 261120   ;;  %v368_v5 = vld [vmem:[%s1739_s4 + $0x18] sm:$0xff]  ;;  %v366_v6 = vld [vmem:[%s1739_s4 + $0x8] sm:$0xff] }
   0xd   : > { %s1445_s9 = sshll.u32 %s1749_s27, 5  ;;  %v365_v7 = vld [vmem:[%s1739_s4] sm:$0xff]  ;;  %v542_v9 = vld [vmem:[%s1741_s6 + $0x8] sm:$0xff]  ;;  %v543_v10 = vld [vmem:[%s1741_s6 + $0x10] sm:$0xff] }
   0xe   : > { %s348_s12 = scalar_lea.vmem %s1736_s1, %s1445_s9  ;;  %v541_v8 = vld [vmem:[%s1741_s6] sm:$0xff]  ;;  %v544_v11 = vld [vmem:[%s1741_s6 + $0x18] sm:$0xff]  ;;  %v371_v12 = vld [vmem:[%s1740_s5 + $0x10] sm:$0xff]  ;;  %s343_s17 = scalar_lea.vmem %s1735_s0, %s1445_s9 }
   0xf   : > { %v364_v0 = vld [vmem:[%s348_s12 + $0x18] sm:$0xff]  ;;  %v363_v1 = vld [vmem:[%s348_s12 + $0x10] sm:$0xff]  ;;  %v362_v2 = vld [vmem:[%s348_s12 + $0x8] sm:$0xff]  ;;  %s356_s18 = scalar_lea.vmem %s1743_s8, %s1445_s9 }
  0x10   : > { %1302 = vmatpush.msra.mxu2 %v364_v0  ;;  %1303 = vmatpush.msra.mxu3 %v364_v0  ;;  %v361_v3 = vld [vmem:[%s348_s12] sm:$0xff]  ;;  %v372_v13 = vld [vmem:[%s1740_s5 + $0x18] sm:$0xff]  ;;  %v370_v14 = vld [vmem:[%s1740_s5 + $0x8] sm:$0xff] }
  0x11   : > { %1301 = vmatpush.msra.mxu1 %v364_v0  ;;  %398 = vmatpush.msra.mxu0 %v364_v0  ;;  %v369_v19 = vld [vmem:[%s1740_s5] sm:$0xff]  ;;  %v1213_v35 = vld [vmem:[%s1739_s4 + $0x28] sm:$0xff]  ;;  %v547_v37 = vld [vmem:[%s1742_s7 + $0x10] sm:$0xff] }
  0x12   : > { %1305 = vmatpush.msra.mxu2 %v363_v1  ;;  %1306 = vmatpush.msra.mxu3 %v363_v1  ;;  %v1212_v32 = vld [vmem:[%s1739_s4 + $0x20] sm:$0xff]  ;;  %v1214_v38 = vld [vmem:[%s1739_s4 + $0x30] sm:$0xff]  ;;  %v546_v39 = vld [vmem:[%s1742_s7 + $0x8] sm:$0xff] }
  0x13   : > { %1304 = vmatpush.msra.mxu1 %v363_v1  ;;  %399 = vmatpush.msra.mxu0 %v363_v1  ;;  %v545_v41 = vld [vmem:[%s1742_s7] sm:$0xff]  ;;  %v548_v42 = vld [vmem:[%s1742_s7 + $0x18] sm:$0xff]  ;;  %v1241_v57 = vld [vmem:[%s1741_s6 + $0x28] sm:$0xff] }
  0x14   : > { %1308 = vmatpush.msra.mxu2 %v362_v2  ;;  %1309 = vmatpush.msra.mxu3 %v362_v2  ;;  %v1215_v48 = vld [vmem:[%s1739_s4 + $0x38] sm:$0xff]  ;;  %v1240_v56 = vld [vmem:[%s1741_s6 + $0x20] sm:$0xff]  ;;  %v1242_v58 = vld [vmem:[%s1741_s6 + $0x30] sm:$0xff] }
  0x15   : > { %1307 = vmatpush.msra.mxu1 %v362_v2  ;;  %400 = vmatpush.msra.mxu0 %v362_v2  ;;  %v1243_v59 = vld [vmem:[%s1741_s6 + $0x38] sm:$0xff]  ;;  %v1218_v63 = vld [vmem:[%s1740_s5 + $0x30] sm:$0xff] }
  0x16   : > { %1311 = vmatpush.msra.mxu2 %v361_v3  ;;  %1312 = vmatpush.msra.mxu3 %v361_v3 }
  0x17   : > { %1210 = vmatmul.msk.f32.vlgmr.msra.gmra.mxu2 %vm373_vm0, %v367_v4  ;;  %1211 = vmatmul.msk.f32.vlgmr.msra.gmra.mxu3 %vm373_vm0, %v368_v5 }
  0x18   : > { %573 = vmatpush.msrb.mxu3 %v364_v0  ;;  %1310 = vmatpush.msra.mxu1 %v361_v3  ;;  %v1217_v0 = vld [vmem:[%s1740_s5 + $0x28] sm:$0xff] }
  0x19   : > { %1209 = vmatmul.msk.f32.vlgmr.msra.gmra.mxu1 %vm373_vm0, %v366_v6  ;;  %401 = vmatpush.msra.mxu0 %v361_v3 }
  0x1a   : > { %574 = vmatpush.msrb.mxu3 %v363_v1  ;;  %1208 = vmatmul.msk.f32.vlgmr.msra.gmra.mxu0 %vm373_vm0, %v365_v7  ;;  %v1219_v1 = vld [vmem:[%s1740_s5 + $0x38] sm:$0xff] }
  0x1c   : > { %575 = vmatpush.msrb.mxu3 %v362_v2 }
  0x1e   : > { %576 = vmatpush.msrb.mxu3 %v361_v3  ;;  %v1216_v3 = vld [vmem:[%s1740_s5 + $0x20] sm:$0xff] }
  0x1f   : > { %1236 = vmatmul.msk.f32.vlgmr.msrb.gmra.mxu3 %vm373_vm0, %v541_v8 }
  0x27   : > { %1237 = vmatmul.msk.f32.gmra.mxu3 %vm373_vm0, %v542_v9 }
  0x2f   : > { %1238 = vmatmul.msk.f32.gmra.mxu3 %vm373_vm0, %v543_v10 }
  0x37   : > { %1239 = vmatmul.msk.f32.gmra.mxu3 %vm373_vm0, %v544_v11 }
  0x96   : > { %v406_v15 = vpop.f32.mrf.mxu1 }
  0x97   : > { %v403_v16 = vpop.f32.mrf.mxu0  ;;  %v407_v22 = vadd.f32 %v406_v15, %v370_v14 }
  0x98   : > { %v404_v23 = vadd.f32 %v403_v16, %v369_v19  ;;  %v1224_v16 = vld [vmem:[%s1739_s4 + $0x40] sm:$0xff]  ;;  %v803_v19 = vld [vmem:[%s343_s17 + $0x10] sm:$0xff] }
  0x99   : > { %v420_v27 = vmul.f32 0.2, %v407_v22  ;;  %vm416_vm3 = vcmp.gt.f32.partialorder %v407_v22, 0.0 }
  0x9a   : > { %v409_v17 = vpop.f32.mrf.mxu2  ;;  %v412_v18 = vpop.f32.mrf.mxu3  ;;  %v419_v29 = vmul.f32 0.2, %v404_v23  ;;  %vm415_vm4 = vcmp.gt.f32.partialorder %v404_v23, 0.0 }
  0x9b   : > { %v410_v20 = vadd.f32 %v409_v17, %v371_v12  ;;  %v413_v21 = vadd.f32 %v412_v18, %v372_v13  ;;  %v424_v31 = vsel %vm416_vm3, %v407_v22, %v420_v27  ;;  %v804_v18 = vld [vmem:[%s343_s17 + $0x18] sm:$0xff]  ;;  %vm792_vm3 = vcmask 7168  }
  0x9c   : > { %v423_v33 = vsel %vm415_vm4, %v404_v23, %v419_v29  ;;  %v801_v23 = vld [vmem:[%s343_s17] sm:$0xff]  ;;  %v1226_v29 = vld [vmem:[%s1739_s4 + $0x50] sm:$0xff] }
  0x9d   : > { %vm418_vm1 = vcmp.gt.f32.partialorder %v413_v21, 0.0  ;;  %v422_v24 = vmul.f32 0.2, %v413_v21  ;;  %v421_v25 = vmul.f32 0.2, %v410_v20  ;;  %vm417_vm2 = vcmp.gt.f32.partialorder %v410_v20, 0.0 }
  0x9f   : > { %v426_v26 = vsel %vm418_vm1, %v413_v21, %v422_v24  ;;  %v425_v28 = vsel %vm417_vm2, %v410_v20, %v421_v25  ;;  %v1381_v20 = vmov 0   ;;  %v802_v21 = vld [vmem:[%s343_s17 + $0x8] sm:$0xff] }
  0xa0   : > { %461 = vmatpush.msrb.mxu1 %v426_v26  ;;  %1339 = vset.pattern.permute.xlu1 %v1381_v20  ;;  %v1225_v24 = vld [vmem:[%s1739_s4 + $0x48] sm:$0xff]  ;;  %v812_v26 = vld [vmem:[%s1738_s3 + $0x18] sm:$0xff] }
  0xa1   : > { %1338 = vset.pattern.permute.xlu0 %v1381_v20  ;;  %1340 = vset.pattern.permute.xlu2 %v1381_v20  ;;  %v810_v25 = vld [vmem:[%s1738_s3 + $0x8] sm:$0xff] }
  0xa2   : > { %462 = vmatpush.msrb.mxu1 %v425_v28  ;;  %v578_v30 = vpop.f32.mrf.mxu3  ;;  %820 = vperm.xlu1 %1339, %v810_v25   ;;  %v1246_v28 = vld [vmem:[%s1742_s7 + $0x30] sm:$0xff] }
  0xa3   : > { %v579_v45 = vadd.f32 %v578_v30, %v545_v41  ;;  %830 = vperm.xlu0 %1338, %v812_v26   ;;  %v1245_v30 = vld [vmem:[%s1742_s7 + $0x28] sm:$0xff]  ;;  %v1227_v41 = vld [vmem:[%s1739_s4 + $0x58] sm:$0xff] }
  0xa4   : > { %463 = vmatpush.msrb.mxu1 %v424_v31 }
  0xa5   : > { %v594_v53 = vmul.f32 0.2, %v579_v45  ;;  %vm590_vm8 = vcmp.gt.f32.partialorder %v579_v45, 0.0 }
  0xa6   : > { %464 = vmatpush.msrb.mxu1 %v423_v33  ;;  %v811_v33 = vld [vmem:[%s1738_s3 + $0x10] sm:$0xff] }
  0xa7   : > { %1220 = vmatmul.msk.f32.vlgmr.msrb.gmra.mxu1 %vm373_vm0, %v1212_v32  ;;  %v598_v55 = vsel %vm590_vm8, %v579_v45, %v594_v53  ;;  %v809_v32 = vld [vmem:[%s1738_s3] sm:$0xff]  ;;  %v1289_v53 = vld [vmem:[%s1738_s3 + $0x48] sm:$0xff] }
  0xaa   : > { %v581_v34 = vpop.f32.mrf.mxu3  ;;  %815 = vperm.xlu1 %1339, %v809_v32  }
  0xab   : > { %v582_v43 = vadd.f32 %v581_v34, %v546_v39  ;;  %v1244_v34 = vld [vmem:[%s1742_s7 + $0x20] sm:$0xff]  ;;  %825 = vperm.xlu0 %1338, %v811_v33  }
  0xad   : > { %v595_v50 = vmul.f32 0.2, %v582_v43  ;;  %vm591_vm7 = vcmp.gt.f32.partialorder %v582_v43, 0.0 }
  0xaf   : > { %1221 = vmatmul.msk.f32.gmra.mxu1 %vm373_vm0, %v1213_v35  ;;  %v599_v54 = vsel %vm591_vm7, %v582_v43, %v595_v50  ;;  %v1247_v35 = vld [vmem:[%s1742_s7 + $0x38] sm:$0xff] }
  0xb2   : > { %v584_v36 = vpop.f32.mrf.mxu3 }
  0xb3   : > { %v585_v40 = vadd.f32 %v584_v36, %v547_v37 }
  0xb5   : > { %v596_v47 = vmul.f32 0.2, %v585_v40  ;;  %vm592_vm5 = vcmp.gt.f32.partialorder %v585_v40, 0.0 }
  0xb7   : > { %1222 = vmatmul.msk.f32.gmra.mxu1 %vm373_vm0, %v1214_v38  ;;  %v600_v52 = vsel %vm592_vm5, %v585_v40, %v596_v47  ;;  %v1277_v47 = vld [vmem:[%s1738_s3 + $0x28] sm:$0xff] }
  0xb8   : > { %904 = vperm.xlu0 %1338, %v1277_v47  }
  0xba   : > { %v587_v44 = vpop.f32.mrf.mxu3 }
  0xbb   : > { %v588_v46 = vadd.f32 %v587_v44, %v548_v42 }
  0xbd   : > { %vm593_vm6 = vcmp.gt.f32.partialorder %v588_v46, 0.0  ;;  %v597_v49 = vmul.f32 0.2, %v588_v46 }
  0xbf   : > { %1223 = vmatmul.msk.f32.gmra.mxu1 %vm373_vm0, %v1215_v48  ;;  %v601_v51 = vsel %vm593_vm6, %v588_v46, %v597_v49  ;;  %v1276_v48 = vld [vmem:[%s1738_s3 + $0x20] sm:$0xff] }
  0xc0   : > { %636 = vmatpush.msrb.mxu0 %v601_v51  ;;  %899 = vperm.xlu1 %1339, %v1276_v48   ;;  %v1252_v51 = vld [vmem:[%s1741_s6 + $0x40] sm:$0xff] }
  0xc1   : > { %987 = vperm.xlu0 %1338, %v1289_v53  }
  0xc2   : > { %637 = vmatpush.msrb.mxu0 %v600_v52  ;;  %v805_v52 = vld [vmem:[%s1737_s2] sm:$0xff] }
  0xc4   : > { %638 = vmatpush.msrb.mxu0 %v599_v54  ;;  %v1290_v54 = vld [vmem:[%s1738_s3 + $0x50] sm:$0xff] }
  0xc6   : > { %639 = vmatpush.msrb.mxu0 %v598_v55  ;;  %v1253_v55 = vld [vmem:[%s1741_s6 + $0x48] sm:$0xff] }
  0xc7   : > { %1248 = vmatmul.msk.f32.vlgmr.msrb.gmra.mxu0 %vm373_vm0, %v1240_v56  ;;  %v806_v56 = vld [vmem:[%s1737_s2 + $0x8] sm:$0xff] }
  0xc8   : > { %992 = vperm.xlu1 %1339, %v1290_v54  }
  0xcf   : > { %1249 = vmatmul.msk.f32.gmra.mxu0 %vm373_vm0, %v1241_v57  ;;  %v1254_v57 = vld [vmem:[%s1741_s6 + $0x50] sm:$0xff] }
  0xd7   : > { %1250 = vmatmul.msk.f32.gmra.mxu0 %vm373_vm0, %v1242_v58  ;;  %v807_v58 = vld [vmem:[%s1737_s2 + $0x10] sm:$0xff] }
  0xdf   : > { %1251 = vmatmul.msk.f32.gmra.mxu0 %vm373_vm0, %v1243_v59  ;;  %v1255_v59 = vld [vmem:[%s1741_s6 + $0x58] sm:$0xff] }
 0x124   : > { %v466_v60 = vpop.f32.mrf.mxu1 }
 0x125   : > { %v467_v7 = vadd.f32 %v1216_v3, %v466_v60  ;;  %v808_v60 = vld [vmem:[%s1737_s2 + $0x18] sm:$0xff]  ;;  %v1229_v3 = vld [vmem:[%s1740_s5 + $0x48] sm:$0xff] }
 0x127   : > { %v482_v13 = vmul.f32 0.2, %v467_v7  ;;  %vm478_vm12 = vcmp.gt.f32.partialorder %v467_v7, 0.0 }
 0x129   : > { %v486_v17 = vsel %vm478_vm12, %v467_v7, %v482_v13 }
 0x12c   : > { %v469_v61 = vpop.f32.mrf.mxu1 }
 0x12d   : > { %v470_v5 = vadd.f32 %v1217_v0, %v469_v61  ;;  %v1279_v61 = vld [vmem:[%s1738_s3 + $0x38] sm:$0xff] }
 0x12e   : > { %914 = vperm.xlu2 %1340, %v1279_v61  }
 0x12f   : > { %v483_v11 = vmul.f32 0.2, %v470_v5  ;;  %vm479_vm11 = vcmp.gt.f32.partialorder %v470_v5, 0.0 }
 0x131   : > { %v487_v15 = vsel %vm479_vm11, %v470_v5, %v483_v11  ;;  %v1291_v11 = vld [vmem:[%s1738_s3 + $0x58] sm:$0xff] }
 0x134   : > { %v472_v62 = vpop.f32.mrf.mxu1 }
 0x135   : > { %v473_v2 = vadd.f32 %v1218_v63, %v472_v62  ;;  %v1228_v62 = vld [vmem:[%s1740_s5 + $0x40] sm:$0xff]  ;;  %v1278_v63 = vld [vmem:[%s1738_s3 + $0x30] sm:$0xff] }
 0x136   : > { %909 = vperm.xlu2 %1340, %v1278_v63  }
 0x137   : > { %v484_v9 = vmul.f32 0.2, %v473_v2  ;;  %vm480_vm10 = vcmp.gt.f32.partialorder %v473_v2, 0.0 }
 0x139   : > { %v488_v12 = vsel %vm480_vm10, %v473_v2, %v484_v9 }
 0x13c   : > { %v475_v4 = vpop.f32.mrf.mxu1 }
 0x13d   : > { %v476_v6 = vadd.f32 %v1219_v1, %v475_v4  ;;  %v1288_v4 = vld [vmem:[%s1738_s3 + $0x40] sm:$0xff] }
 0x13e   : > { %982 = vperm.xlu2 %1340, %v1288_v4  }
 0x13f   : > { %vm481_vm9 = vcmp.gt.f32.partialorder %v476_v6, 0.0  ;;  %v485_v8 = vmul.f32 0.2, %v476_v6 }
 0x141   : > { %v489_v10 = vsel %vm481_vm9, %v476_v6, %v485_v8 }
 0x142   : > { %524 = vmatpush.msrb.mxu2 %v489_v10  ;;  %v1230_v10 = vld [vmem:[%s1740_s5 + $0x50] sm:$0xff] }
 0x144   : > { %525 = vmatpush.msrb.mxu2 %v488_v12  ;;  %v641_v14 = vpop.f32.mrf.mxu0 }
 0x145   : > { %v642_v38 = vadd.f32 %v1244_v34, %v641_v14 }
 0x146   : > { %526 = vmatpush.msrb.mxu2 %v487_v15  ;;  %997 = vperm.xlu2 %1340, %v1291_v11  }
 0x147   : > { %v657_v44 = vmul.f32 0.2, %v642_v38  ;;  %vm653_vm1 = vcmp.gt.f32.partialorder %v642_v38, 0.0 }
 0x148   : > { %527 = vmatpush.msrb.mxu2 %v486_v17 }
 0x149   : > { %1232 = vmatmul.msk.f32.vlgmr.msrb.gmra.mxu2 %vm373_vm0, %v1224_v16  ;;  %v661_v50 = vsel %vm653_vm1, %v642_v38, %v657_v44 }
 0x14a   : > { %858 = vmatpush.msra.mxu2 %v804_v18 }
 0x14c   : > { %v644_v22 = vpop.f32.mrf.mxu0  ;;  %859 = vmatpush.msra.mxu2 %v803_v19  ;;  %v1231_v19 = vld [vmem:[%s1740_s5 + $0x58] sm:$0xff] }
 0x14d   : > { %v645_v36 = vadd.f32 %v1245_v30, %v644_v22 }
 0x14e   : > { %860 = vmatpush.msra.mxu2 %v802_v21 }
 0x14f   : > { %v658_v42 = vmul.f32 0.2, %v645_v36  ;;  %vm654_vm15 = vcmp.gt.f32.partialorder %v645_v36, 0.0 }
 0x150   : > { %861 = vmatpush.msra.mxu2 %v801_v23  ;;  %v1256_v23 = vld [vmem:[%s1742_s7 + $0x40] sm:$0xff] }
 0x151   : > { %1233 = vmatmul.msk.f32.gmra.mxu2 %vm373_vm0, %v1225_v24  ;;  %v662_v49 = vsel %vm654_vm15, %v645_v36, %v658_v42 }
 0x154   : > { %v647_v27 = vpop.f32.mrf.mxu0 }
 0x155   : > { %v648_v31 = vadd.f32 %v1246_v28, %v647_v27 }
 0x157   : > { %v659_v39 = vmul.f32 0.2, %v648_v31  ;;  %vm655_vm13 = vcmp.gt.f32.partialorder %v648_v31, 0.0 }
 0x159   : > { %1234 = vmatmul.msk.f32.gmra.mxu2 %vm373_vm0, %v1226_v29  ;;  %v663_v46 = vsel %vm655_vm13, %v648_v31, %v659_v39 }
 0x15c   : > { %v650_v37 = vpop.f32.mrf.mxu0 }
 0x15d   : > { %v651_v40 = vadd.f32 %v1247_v35, %v650_v37 }
 0x15f   : > { %vm656_vm14 = vcmp.gt.f32.partialorder %v651_v40, 0.0  ;;  %v660_v43 = vmul.f32 0.2, %v651_v40 }
 0x161   : > { %1235 = vmatmul.msk.f32.gmra.mxu2 %vm373_vm0, %v1227_v41  ;;  %v664_v45 = vsel %vm656_vm14, %v651_v40, %v660_v43  ;;  %v1257_v41 = vld [vmem:[%s1742_s7 + $0x48] sm:$0xff] }
 0x162   : > { %699 = vmatpush.msra.mxu1 %v664_v45 }
 0x164   : > { %700 = vmatpush.msra.mxu1 %v663_v46 }
 0x166   : > { %701 = vmatpush.msra.mxu1 %v662_v49 }
 0x168   : > { %702 = vmatpush.msra.mxu1 %v661_v50 }
 0x169   : > { %1260 = vmatmul.msk.f32.vlgmr.msra.gmra.mxu1 %vm373_vm0, %v1252_v51  ;;  %1268 = vmatmul.msk.f32.vlgmr.msra.gmra.mxu2 %vm373_vm0, %v805_v52 }
 0x171   : > { %1261 = vmatmul.msk.f32.gmra.mxu1 %vm373_vm0, %v1253_v55  ;;  %1269 = vmatmul.msk.f32.gmra.mxu2 %vm373_vm0, %v806_v56 }
 0x179   : > { %1262 = vmatmul.msk.f32.gmra.mxu1 %vm373_vm0, %v1254_v57  ;;  %1270 = vmatmul.msk.f32.gmra.mxu2 %vm373_vm0, %v807_v58 }
 0x181   : > { %1263 = vmatmul.msk.f32.gmra.mxu1 %vm373_vm0, %v1255_v59  ;;  %1271 = vmatmul.msk.f32.gmra.mxu2 %vm373_vm0, %v808_v60  ;;  %v1258_v59 = vld [vmem:[%s1742_s7 + $0x50] sm:$0xff] }
 0x1cc   : > { %v529_v0 = vpop.f32.mrf.mxu2 }
 0x1cd   : > { %v530_v1 = vadd.f32 %v1228_v62, %v529_v0 }
 0x1cf   : > { %v1264_v2 = vmul.f32 -1.442695, %v530_v1 }
 0x1d1   : > { %1341 = vpow2.f32 %v1264_v2 }
 0x1d4   : > { %v532_v5 = vpop.f32.mrf.mxu2 }
 0x1d5   : > { %v533_v6 = vadd.f32 %v1229_v3, %v532_v5  ;;  %v831_v3 = vpop.permute.xlu0 %830 }
 0x1d7   : > { %v1342_v7 = vpop.eup %1341  ;;  %v1265_v8 = vmul.f32 -1.442695, %v533_v6 }
 0x1d8   : > { %v728_v9 = vadd.f32 1.0, %v1342_v7  ;;  %v821_v7 = vpop.permute.xlu1 %820 }
 0x1d9   : > { %1343 = vpow2.f32 %v1265_v8 }
 0x1da   : > { %1345 = vrcp.f32 %v728_v9  ;;  %v743_v21 = vand.u32 2147483648, %v728_v9  ;;  %v741_v25 = vand.u32 2147483647, %v728_v9  ;;  %vm737_vm4 = vweird.f32 %v728_v9 }
 0x1dc   : > { %v535_v12 = vpop.f32.mrf.mxu2  ;;  %v744_v33 = vor.u32 1.1754944e-38, %v743_v21  ;;  %vm742_vm6 = vcmp.eq.f32.partialorder %v741_v25, 8.507059e+37 }
 0x1dd   : > { %v536_v13 = vadd.f32 %v1230_v10, %v535_v12  ;;  %v1259_v12 = vld [vmem:[%s1742_s7 + $0x58] sm:$0xff]  ;;  %v826_v21 = vpop.permute.xlu0 %825 }
 0x1df   : > { %v1344_v14 = vpop.eup %1343  ;;  %v1266_v15 = vmul.f32 -1.442695, %v536_v13 }
 0x1e0   : > { %v1346_v16 = vpop.eup %1345  ;;  %v729_v17 = vadd.f32 1.0, %v1344_v14 }
 0x1e1   : > { %v733_v18 = vmul.f32 %v1346_v16, %v728_v9  ;;  %1347 = vpow2.f32 %v1266_v15  ;;  %vm738_vm2 = vweird.f32 %v1346_v16 }
 0x1e2   : > { %1349 = vrcp.f32 %v729_v17  ;;  %vm739_vm5 = vmor %vm737_vm4, %vm738_vm2  ;;  %v758_v39 = vand.u32 2147483648, %v729_v17  ;;  %v756_v43 = vand.u32 2147483647, %v729_v17  ;;  %vm752_vm8 = vweird.f32 %v729_v17 }
 0x1e3   : > { %v734_v20 = vsub.f32 1.0, %v733_v18 }
 0x1e4   : > { %v538_v22 = vpop.f32.mrf.mxu2  ;;  %v759_v49 = vor.u32 1.1754944e-38, %v758_v39  ;;  %vm757_vm10 = vcmp.eq.f32.partialorder %v756_v43, 8.507059e+37  ;;  %v1274_v43 = vld [vmem:[%s1737_s2 + $0x30] sm:$0xff] }
 0x1e5   : > { %v735_v24 = vmul.f32 %v1346_v16, %v734_v20  ;;  %v539_v26 = vadd.f32 %v1231_v19, %v538_v22 }
 0x1e6   : > { %v704_v27 = vpop.f32.mrf.mxu1 }
 0x1e7   : > { %v1348_v28 = vpop.eup %1347  ;;  %v736_v29 = vadd.f32 %v1346_v16, %v735_v24  ;;  %v1267_v30 = vmul.f32 -1.442695, %v539_v26  ;;  %v705_v31 = vadd.f32 %v1256_v23, %v704_v27  ;;  %v816_v24 = vpop.permute.xlu1 %815 }
 0x1e8   : > { %v1350_v32 = vpop.eup %1349  ;;  %v730_v34 = vadd.f32 1.0, %v1348_v28 }
 0x1e9   : > { %v740_v35 = vsel %vm739_vm5, %v1346_v16, %v736_v29  ;;  %v748_v36 = vmul.f32 %v1350_v32, %v729_v17  ;;  %1351 = vpow2.f32 %v1267_v30  ;;  %797 = vst.msk [vmem:[#allocation3] sm:$0xff] %vm792_vm3, %v705_v31  ;;  %vm753_vm7 = vweird.f32 %v1350_v32 }
 0x1ea   : > { %v745_v37 = vsel %vm742_vm6, %v744_v33, %v740_v35  ;;  %1353 = vrcp.f32 %v730_v34  ;;  %vm754_vm9 = vmor %vm752_vm8, %vm753_vm7  ;;  %v773_v57 = vand.u32 2147483648, %v730_v34  ;;  %v771_v61 = vand.u32 2147483647, %v730_v34 }
 0x1eb   : > { %v749_v38 = vsub.f32 1.0, %v748_v36  ;;  %793 = vst.msk [vmem:[#allocation2] sm:$0xff] %vm792_vm3, %v745_v37  ;;  %vm767_vm12 = vweird.f32 %v730_v34 }
 0x1ec   : > { %v1668_v40 = vpop.f32.mrf.mxu2  ;;  %v774_v2 = vor.u32 1.1754944e-38, %v773_v57  ;;  %vm772_vm14 = vcmp.eq.f32.partialorder %v771_v61, 8.507059e+37 }
 0x1ed   : > { %v750_v42 = vmul.f32 %v1350_v32, %v749_v38  ;;  %v864_v28 = vadd.f32 %v1668_v40, %v816_v24  ;;  %v1272_v38 = vld [vmem:[%s1737_s2 + $0x20] sm:$0xff] }
 0x1ee   : > { %v707_v44 = vpop.f32.mrf.mxu1 }
 0x1ef   : > { %v1352_v45 = vpop.eup %1351  ;;  %v751_v46 = vadd.f32 %v1350_v32, %v750_v42  ;;  %v708_v47 = vadd.f32 %v1257_v41, %v707_v44  ;;  %v879_v35 = vmul.f32 0.2, %v864_v28  ;;  %v1273_v42 = vld [vmem:[%s1737_s2 + $0x28] sm:$0xff]  ;;  %v1275_v44 = vld [vmem:[%s1737_s2 + $0x38] sm:$0xff] }
 0x1f0   : > { %v1354_v48 = vpop.eup %1353  ;;  %v731_v50 = vadd.f32 1.0, %v1352_v45  ;;  %v1069_v51 = vld [vmem:[#allocation3] sm:$0xff] }
 0x1f1   : > { %v755_v52 = vsel %vm754_vm9, %v1350_v32, %v751_v46  ;;  %v763_v53 = vmul.f32 %v1354_v48, %v730_v34  ;;  %798 = vst.msk [vmem:[#allocation3 + $0x8] sm:$0xff] %vm792_vm3, %v708_v47  ;;  %1075 = vperm.xlu1 %1339, %v1069_v51   ;;  %vm768_vm11 = vweird.f32 %v1354_v48  ;;  %v915_v47 = vpop.permute.xlu2 %914  ;;  %v905_v51 = vpop.permute.xlu0 %904 }
 0x1f2   : > { %v760_v54 = vsel %vm757_vm10, %v759_v49, %v755_v52  ;;  %1355 = vrcp.f32 %v731_v50  ;;  %v1041_v55 = vld [vmem:[#allocation2] sm:$0xff]  ;;  %vm769_vm13 = vmor %vm767_vm12, %vm768_vm11  ;;  %v788_v10 = vand.u32 2147483648, %v731_v50  ;;  %v786_v14 = vand.u32 2147483647, %v731_v50 }
 0x1f3   : > { %v764_v56 = vsub.f32 1.0, %v763_v53  ;;  %794 = vst.msk [vmem:[#allocation2 + $0x8] sm:$0xff] %vm792_vm3, %v760_v54  ;;  %1047 = vperm.xlu0 %1338, %v1041_v55   ;;  %vm782_vm1 = vweird.f32 %v731_v50  ;;  %v900_v55 = vpop.permute.xlu1 %899  ;;  %vm1097_vm12 = vcmask 64512  }
 0x1f4   : > { %v866_v58 = vpop.f32.mrf.mxu2  ;;  %v789_v18 = vor.u32 1.1754944e-38, %v788_v10  ;;  %vm787_vm4 = vcmp.eq.f32.partialorder %v786_v14, 8.507059e+37 }
 0x1f5   : > { %v765_v60 = vmul.f32 %v1354_v48, %v764_v56  ;;  %v867_v26 = vadd.f32 %v866_v58, %v821_v7 }
 0x1f6   : > { %v710_v62 = vpop.f32.mrf.mxu1 }
 0x1f7   : > { %v766_v63 = vadd.f32 %v1354_v48, %v765_v60  ;;  %v711_v0 = vadd.f32 %v1258_v59, %v710_v62  ;;  %v880_v32 = vmul.f32 0.2, %v867_v26  ;;  %vm876_vm7 = vcmp.gt.f32.partialorder %v867_v26, 0.0 }
 0x1f8   : > { %v1356_v1 = vpop.eup %1355  ;;  %v1070_v39 = vld [vmem:[#allocation3 + $0x8] sm:$0xff] }
 0x1f9   : > { %v770_v4 = vsel %vm769_vm13, %v1354_v48, %v766_v63  ;;  %v778_v5 = vmul.f32 %v1356_v1, %v731_v50  ;;  %799 = vst.msk [vmem:[#allocation3 + $0x10] sm:$0xff] %vm792_vm3, %v711_v0  ;;  %vm783_vm15 = vweird.f32 %v1356_v1  ;;  %v884_v37 = vsel %vm876_vm7, %v867_v26, %v880_v32  ;;  %v910_v49 = vpop.permute.xlu2 %909  ;;  %v1284_v0 = vld [vmem:[%s1737_s2 + $0x40] sm:$0xff] }
 0x1fa   : > { %v775_v6 = vsel %vm772_vm14, %v774_v2, %v770_v4  ;;  %v1042_v8 = vld [vmem:[#allocation2 + $0x8] sm:$0xff]  ;;  %vm784_vm2 = vmor %vm782_vm1, %vm783_vm15  ;;  %v1287_v4 = vld [vmem:[%s1737_s2 + $0x58] sm:$0xff] }
 0x1fb   : > { %v779_v9 = vsub.f32 1.0, %v778_v5  ;;  %795 = vst.msk [vmem:[#allocation2 + $0x10] sm:$0xff] %vm792_vm3, %v775_v6  ;;  %1052 = vperm.xlu1 %1339, %v1042_v8   ;;  %v1285_v2 = vld [vmem:[%s1737_s2 + $0x48] sm:$0xff]  ;;  %v988_v6 = vpop.permute.xlu0 %987  ;;  %v993_v7 = vpop.permute.xlu1 %992 }
 0x1fc   : > { %v869_v11 = vpop.f32.mrf.mxu2 }
 0x1fd   : > { %v780_v13 = vmul.f32 %v1356_v1, %v779_v9  ;;  %v870_v23 = vadd.f32 %v869_v11, %v826_v21 }
 0x1fe   : > { %v713_v15 = vpop.f32.mrf.mxu1 }
 0x1ff   : > { %v781_v16 = vadd.f32 %v1356_v1, %v780_v13  ;;  %v714_v17 = vadd.f32 %v1259_v12, %v713_v15  ;;  %v881_v29 = vmul.f32 0.2, %v870_v23  ;;  %vm877_vm6 = vcmp.gt.f32.partialorder %v870_v23, 0.0 }
 0x200   : > { %v1071_v41 = vld [vmem:[#allocation3 + $0x10] sm:$0xff] }
 0x201   : > { %v785_v19 = vsel %vm784_vm2, %v1356_v1, %v781_v16  ;;  %800 = vst.msk [vmem:[#allocation3 + $0x18] sm:$0xff] %vm792_vm3, %v714_v17  ;;  %v885_v36 = vsel %vm877_vm6, %v870_v23, %v881_v29  ;;  %v983_v5 = vpop.permute.xlu2 %982 }
 0x202   : > { %v790_v20 = vsel %vm787_vm4, %v789_v18, %v785_v19  ;;  %v1043_v22 = vld [vmem:[#allocation2 + $0x10] sm:$0xff] }
 0x203   : > { %796 = vst.msk [vmem:[#allocation2 + $0x18] sm:$0xff] %vm792_vm3, %v790_v20  ;;  %1057 = vperm.xlu2 %1340, %v1043_v22   ;;  %vm875_vm3 = vcmp.gt.f32.partialorder %v864_v28, 0.0 }
 0x204   : > { %v872_v25 = vpop.f32.mrf.mxu2  ;;  %v883_v40 = vsel %vm875_vm3, %v864_v28, %v879_v35 }
 0x205   : > { %v873_v27 = vadd.f32 %v872_v25, %v831_v3  ;;  %v1286_v3 = vld [vmem:[%s1737_s2 + $0x50] sm:$0xff] }
 0x207   : > { %vm878_vm5 = vcmp.gt.f32.partialorder %v873_v27, 0.0  ;;  %v882_v30 = vmul.f32 0.2, %v873_v27 }
 0x208   : > { %v1072_v31 = vld [vmem:[#allocation3 + $0x18] sm:$0xff] }
 0x209   : > { %1090 = vperm.xlu1 %1339, %v1072_v31   ;;  %v886_v33 = vsel %vm878_vm5, %v873_v27, %v882_v30  ;;  %v998_v8 = vpop.permute.xlu2 %997 }
 0x20a   : > { %941 = vmatpush.msra.mxu3 %v886_v33  ;;  %v1044_v34 = vld [vmem:[#allocation2 + $0x18] sm:$0xff] }
 0x20b   : > { %1062 = vperm.xlu0 %1338, %v1044_v34   ;;  %1080 = vperm.xlu2 %1340, %v1070_v39  }
 0x20c   : > { %942 = vmatpush.msra.mxu3 %v885_v36 }
 0x20e   : > { %943 = vmatpush.msra.mxu3 %v884_v37 }
 0x210   : > { %944 = vmatpush.msra.mxu3 %v883_v40 }
 0x211   : > { %1280 = vmatmul.msk.f32.vlgmr.msra.gmra.mxu3 %vm373_vm0, %v1272_v38 }
 0x213   : > { %1085 = vperm.xlu0 %1338, %v1071_v41  }
 0x219   : > { %1281 = vmatmul.msk.f32.gmra.mxu3 %vm373_vm0, %v1273_v42 }
 0x221   : > { %1282 = vmatmul.msk.f32.gmra.mxu3 %vm373_vm0, %v1274_v43 }
 0x229   : > { %1283 = vmatmul.msk.f32.gmra.mxu3 %vm373_vm0, %v1275_v44 }
 0x25d   : > { %v1058_v14 = vpop.permute.xlu2 %1057 }
 0x263   : > { %v1076_v11 = vpop.permute.xlu1 %1075 }
 0x265   : > { %v1048_v12 = vpop.permute.xlu0 %1047  ;;  %v1081_v21 = vpop.permute.xlu2 %1080 }
 0x26d   : > { %v1053_v18 = vpop.permute.xlu1 %1052 }
 0x27b   : > { %v1091_v31 = vpop.permute.xlu1 %1090 }
 0x27d   : > { %v1063_v19 = vpop.permute.xlu0 %1062 }
 0x285   : > { %v1086_v26 = vpop.permute.xlu0 %1085 }
 0x294   : > { %v946_v45 = vpop.f32.mrf.mxu3 }
 0x295   : > { %v947_v56 = vadd.f32 %v946_v45, %v900_v55 }
 0x297   : > { %v962_v61 = vmul.f32 0.2, %v947_v56  ;;  %vm958_vm11 = vcmp.gt.f32.partialorder %v947_v56, 0.0 }
 0x299   : > { %v966_v1 = vsel %vm958_vm11, %v947_v56, %v962_v61 }
 0x29c   : > { %v949_v46 = vpop.f32.mrf.mxu3 }
 0x29d   : > { %v950_v53 = vadd.f32 %v949_v46, %v905_v51 }
 0x29f   : > { %v963_v59 = vmul.f32 0.2, %v950_v53  ;;  %vm959_vm10 = vcmp.gt.f32.partialorder %v950_v53, 0.0 }
 0x2a1   : > { %v967_v63 = vsel %vm959_vm10, %v950_v53, %v963_v59 }
 0x2a4   : > { %v952_v48 = vpop.f32.mrf.mxu3 }
 0x2a5   : > { %v953_v50 = vadd.f32 %v952_v48, %v910_v49 }
 0x2a7   : > { %v964_v57 = vmul.f32 0.2, %v953_v50  ;;  %vm960_vm9 = vcmp.gt.f32.partialorder %v953_v50, 0.0 }
 0x2a9   : > { %v968_v62 = vsel %vm960_vm9, %v953_v50, %v964_v57 }
 0x2ac   : > { %v955_v52 = vpop.f32.mrf.mxu3 }
 0x2ad   : > { %v956_v54 = vadd.f32 %v955_v52, %v915_v47 }
 0x2af   : > { %vm961_vm8 = vcmp.gt.f32.partialorder %v956_v54, 0.0  ;;  %v965_v58 = vmul.f32 0.2, %v956_v54 }
 0x2b1   : > { %v969_v60 = vsel %vm961_vm8, %v956_v54, %v965_v58 }
 0x2b2   : > { %1024 = vmatpush.msra.mxu0 %v969_v60 }
 0x2b4   : > { %1025 = vmatpush.msra.mxu0 %v968_v62 }
 0x2b6   : > { %1026 = vmatpush.msra.mxu0 %v967_v63 }
 0x2b8   : > { %1027 = vmatpush.msra.mxu0 %v966_v1 }
 0x2b9   : > { %1292 = vmatmul.msk.f32.vlgmr.msra.gmra.mxu0 %vm373_vm0, %v1284_v0 }
 0x2c1   : > { %1293 = vmatmul.msk.f32.gmra.mxu0 %vm373_vm0, %v1285_v2 }
 0x2c9   : > { %1294 = vmatmul.msk.f32.gmra.mxu0 %vm373_vm0, %v1286_v3 }
 0x2d1   : > { %1295 = vmatmul.msk.f32.gmra.mxu0 %vm373_vm0, %v1287_v4 }
 0x336   : > { %v1029_v9 = vpop.f32.mrf.mxu0 }
 0x337   : > { %v1030_v10 = vadd.f32 %v1029_v9, %v983_v5 }
 0x339   : > { %v1065_v13 = vmul.f32 %v1048_v12, %v1030_v10 }
 0x33b   : > { %v1093_v15 = vadd.f32 %v1076_v11, %v1065_v13 }
 0x33d   : > { %1098 = vst.msk [vmem:[%s356_s18] sm:$0xff] %vm1097_vm12, %v1093_v15 }
 0x33e   : > { %v1032_v16 = vpop.f32.mrf.mxu0 }
 0x33f   : > { %v1033_v17 = vadd.f32 %v1032_v16, %v988_v6 }
 0x341   : > { %v1066_v20 = vmul.f32 %v1053_v18, %v1033_v17 }
 0x343   : > { %v1094_v22 = vadd.f32 %v1081_v21, %v1066_v20 }
 0x345   : > { %1099 = vst.msk [vmem:[%s356_s18 + $0x8] sm:$0xff] %vm1097_vm12, %v1094_v22 }
 0x346   : > { %v1035_v23 = vpop.f32.mrf.mxu0 }
 0x347   : > { %v1036_v24 = vadd.f32 %v1035_v23, %v993_v7 }
 0x349   : > { %v1067_v25 = vmul.f32 %v1058_v14, %v1036_v24 }
 0x34b   : > { %v1095_v27 = vadd.f32 %v1086_v26, %v1067_v25 }
 0x34d   : > { %1100 = vst.msk [vmem:[%s356_s18 + $0x10] sm:$0xff] %vm1097_vm12, %v1095_v27 }
 0x34e   : > { %v1038_v28 = vpop.f32.mrf.mxu0 }
 0x34f   : > { %v1039_v29 = vadd.f32 %v1038_v28, %v998_v8 }
 0x351   : > { %v1068_v30 = vmul.f32 %v1063_v19, %v1039_v29 }
 0x353   : > { %v1096_v32 = vadd.f32 %v1091_v31, %v1068_v30 }
 0x355   : > { %1101 = vst.msk [vmem:[%s356_s18 + $0x18] sm:$0xff] %vm1097_vm12, %v1096_v32 }
 0x356 PF: > { %s18_s29 = sadd.s32 1, %s1379_s29   ;;  %s1744_s27 = smov %s1375_s28 }
 0x357   : > { %p15_p5 = scmp.ge.s32.totalorder %s18_s29, 4   ;;  %s1745_s28 = smov %s1747_s30 }
 0x359   :  { %17 = sbr.rel (!%p15_p5) target bundleno = 2 (0x2), region = 101 }

</bundles_post_ra>
